<compile_context>
chip_gen: v5e
topology: v5e:2x2
jax: 0.10.0
libtpu: 0.0.40
codegen_flags: <defaults>
</compile_context>

<pallas_src>
import functools
import math

import jax
import jax.numpy as jnp
from jax.experimental import pallas as pl
from jax.experimental.pallas import tpu as pltpu


# ----------------------------- fused Pallas kernel ---------------------------

def _mha_kernel(xq_ref, xk_ref, xv_ref,
                wq_ref, bq_ref, wk_ref, bk_ref, wv_ref, bv_ref,
                wo_ref, bo_ref,
                o_ref, *, h, d_k, bt, s):
    # Per grid step (rows = bt * s flattened (batch, seq) rows):
    #   x*_ref      : (rows, D)      bf16
    #   w{q,k,v}_ref: (h, D, d_k)    bf16   (head-major, pre-transposed to (in, out))
    #   b{q,k,v}_ref: (h, 1, d_k)    f32
    #   wo_ref      : (h, d_k, D)    bf16
    #   bo_ref      : (1, D)         f32
    #   o_ref       : (rows, D)
    rows = bt * s
    d_model = o_ref.shape[-1]
    scale = 1.0 / math.sqrt(d_k)

    xq = xq_ref[...]
    xk = xk_ref[...]
    xv = xv_ref[...]

    acc = jnp.zeros((rows, d_model), jnp.float32)

    for hd in range(h):
        # Per-head projections: leading-axis ref index, no lane-dim slicing.
        # torch nn.Linear (y = x @ W.T + b); W.T was done on the host.
        # The 1/sqrt(d_k) scale is folded into q (bias included) - exact.
        q = (jnp.dot(xq, wq_ref[hd], preferred_element_type=jnp.float32)
             + bq_ref[hd]) * scale                                       # (rows, d_k) f32
        k = jnp.dot(xk, wk_ref[hd], preferred_element_type=jnp.float32) + bk_ref[hd]
        v = jnp.dot(xv, wv_ref[hd], preferred_element_type=jnp.float32) + bv_ref[hd]

        # (rows, d_k) -> (bt, s, d_k): layout-preserving sublane split (s % 8 == 0).
        qb = q.astype(jnp.bfloat16).reshape(bt, s, d_k)
        kb = k.astype(jnp.bfloat16).reshape(bt, s, d_k)
        vb = v.astype(jnp.bfloat16).reshape(bt, s, d_k)

        # scores = q @ k^T (bf16 into MXU, f32 accumulation); softmax in f32.
        sc = jnp.einsum('bqd,bkd->bqk', qb, kb,
                        preferred_element_type=jnp.float32)              # (bt, s, s)
        sc = sc - jnp.max(sc, axis=-1, keepdims=True)
        p = jnp.exp(sc)
        denom = jnp.sum(p, axis=-1, keepdims=True)
        inv = pl.reciprocal(denom, approx=True)
        inv = inv * (2.0 - denom * inv)            # one Newton step -> ~f32 accuracy
        p = (p * inv).astype(jnp.bfloat16)

        ctx = jnp.einsum('bqk,bkd->bqd', p, vb,
                         preferred_element_type=jnp.float32)             # (bt, s, d_k)
        ctx = ctx.reshape(rows, d_k).astype(jnp.bfloat16)

        # Accumulated output projection: no lane-dim concat of per-head contexts.
        acc = acc + jnp.dot(ctx, wo_ref[hd], preferred_element_type=jnp.float32)

    o_ref[...] = (acc + bo_ref[...]).astype(o_ref.dtype)


def multi_headed_attention(params, query, key, value, h):
    """Mirror of MultiHeadedAttention.forward (mask=None, eval-mode dropout).

    params: ((wq, bq), (wk, bk), (wv, bv), (wo, bo)) in torch layout: W (out, in), b (out,).
    query/key/value: (B, S, D) float32.
    """
    B, S, D = query.shape
    assert D % h == 0
    d_k = D // h
    (wq, bq), (wk, bk), (wv, bv), (wo, bo) = params

    # ---- one-time host-side layout / dtype prep (bf16 weights, head-major) ----
    def head_major_in(w):  # torch (out, in) -> W.T (in, out) -> (h, in=D, d_k)
        return jnp.transpose(w.T.reshape(D, h, d_k), (1, 0, 2)).astype(jnp.bfloat16)

    wq_hm, wk_hm, wv_hm = head_major_in(wq), head_major_in(wk), head_major_in(wv)
    wo_hm = wo.T.reshape(h, d_k, D).astype(jnp.bfloat16)   # (h, d_k, D)

    bq_hm = bq.reshape(h, 1, d_k).astype(jnp.float32)
    bk_hm = bk.reshape(h, 1, d_k).astype(jnp.float32)
    bv_hm = bv.reshape(h, 1, d_k).astype(jnp.float32)
    bo_2d = bo.reshape(1, D).astype(jnp.float32)

    # Flatten (B, S, D) -> (B*S, D): projections see many rows per MXU pass; the
    # grid then blocks whole batch groups per step (amortizes per-step overhead).
    xq2 = query.reshape(B * S, D).astype(jnp.bfloat16)
    xk2 = key.reshape(B * S, D).astype(jnp.bfloat16)
    xv2 = value.reshape(B * S, D).astype(jnp.bfloat16)

    # Batch elements per grid step: target ~128 rows/step; keep B % bt == 0 so
    # every block is full (no ragged tail).
    bt = max(1, min(B, 128 // max(S, 1)))
    while B % bt:
        bt -= 1
    rows = bt * S
    grid = (B // bt,)

    x_spec = pl.BlockSpec((rows, D), lambda i: (i, 0))
    w_in_spec = pl.BlockSpec((h, D, d_k), lambda i: (0, 0, 0))
    b_in_spec = pl.BlockSpec((h, 1, d_k), lambda i: (0, 0, 0))
    w_out_spec = pl.BlockSpec((h, d_k, D), lambda i: (0, 0, 0))
    b_out_spec = pl.BlockSpec((1, D), lambda i: (0, 0))

    kernel = functools.partial(_mha_kernel, h=h, d_k=d_k, bt=bt, s=S)
    out2 = pl.pallas_call(
        kernel,
        out_shape=jax.ShapeDtypeStruct((B * S, D), query.dtype),
        grid_spec=pltpu.PrefetchScalarGridSpec(
            num_scalar_prefetch=0,
            grid=grid,
            in_specs=[x_spec, x_spec, x_spec,
                      w_in_spec, b_in_spec, w_in_spec, b_in_spec,
                      w_in_spec, b_in_spec, w_out_spec, b_out_spec],
            out_specs=x_spec,
        ),
        compiler_params=pltpu.CompilerParams(
            dimension_semantics=("parallel",)),
    )(xq2, xk2, xv2,
      wq_hm, bq_hm, wk_hm, bk_hm, wv_hm, bv_hm, wo_hm, bo_2d)
    return out2.reshape(B, S, D)


def reference_mha(params, query, key, value, h):
    """Pure-JAX f32 reference with identical module semantics (for verification)."""
    B, S, D = query.shape
    d_k = D // h
    (wq, bq), (wk, bk), (wv, bv), (wo, bo) = params

    def lin(x, w, b):
        return x @ w.T + b

    def proj(x, w, b):
        return lin(x, w, b).reshape(B, S, h, d_k).transpose(0, 2, 1, 3)

    q, k, v = proj(query, wq, bq), proj(key, wk, bk), proj(value, wv, bv)
    scores = jnp.einsum("bhqd,bhkd->bhqk", q, k) / math.sqrt(d_k)
    p = jax.nn.softmax(scores, axis=-1)
    ctx = jnp.einsum("bhqk,bhkd->bhqd", p, v)
    ctx = ctx.transpose(0, 2, 1, 3).reshape(B, S, D)
    return lin(ctx, wo, bo)


# ----------------------------------- main -------------------------------------

if __name__ == "__main__":
    B, S, D, H = 2, 8, 32, 4   # batch, seq, d_model, heads (d_k = 8)

    root = jax.random.PRNGKey(0)
    keys = jax.random.split(root, 11)

    # Deterministic parameter init (PyTorch-Linear-like uniform bound 1/sqrt(in)).
    bound = 1.0 / math.sqrt(D)
    params = []
    for i in range(4):
        w = jax.random.uniform(keys[i], (D, D), jnp.float32, -bound, bound)
        b = jax.random.uniform(keys[4 + i], (D,), jnp.float32, -bound, bound)
        params.append((w, b))

    query = jax.random.normal(keys[8], (B, S, D), jnp.float32)
    key_in = jax.random.normal(keys[9], (B, S, D), jnp.float32)
    value = jax.random.normal(keys[10], (B, S, D), jnp.float32)

    out = multi_headed_attention(params, query, key_in, value, H)
    out = jax.block_until_ready(out)

    ref = reference_mha(params, query, key_in, value, H)
    assert out.shape == (B, S, D)
    # Tolerance accounts for bf16 MXU inputs (activations/weights/probs) vs the
    # pure-f32 reference; accumulation is still f32 everywhere.
    assert jnp.allclose(out, ref, atol=2e-2, rtol=2e-2), "Pallas output mismatch vs reference"

    print("KERNEL_OK")
</pallas_src>

<mosaic_0001>
module attributes {stable_mosaic.version = 11 : i64} {
  func.func @_mha_kernel(%arg0: i32, %arg1: memref<16x32xbf16, #tpu.memory_space<vmem>>, %arg2: memref<16x32xbf16, #tpu.memory_space<vmem>>, %arg3: memref<16x32xbf16, #tpu.memory_space<vmem>>, %arg4: memref<4x32x8xbf16, #tpu.memory_space<vmem>>, %arg5: memref<4x1x8xf32, #tpu.memory_space<vmem>>, %arg6: memref<4x32x8xbf16, #tpu.memory_space<vmem>>, %arg7: memref<4x1x8xf32, #tpu.memory_space<vmem>>, %arg8: memref<4x32x8xbf16, #tpu.memory_space<vmem>>, %arg9: memref<4x1x8xf32, #tpu.memory_space<vmem>>, %arg10: memref<4x8x32xbf16, #tpu.memory_space<vmem>>, %arg11: memref<1x32xf32, #tpu.memory_space<vmem>>, %arg12: memref<16x32xf32, #tpu.memory_space<vmem>>) attributes {dimension_semantics = [#tpu.dimension_semantics<parallel>], iteration_bounds = array<i64: 1>, scalar_prefetch = 0 : i64, scratch_operands = 0 : i64, tpu.core_type = #tpu.core_type<tc>, window_params = [{transform_indices = @transform_0, window_bounds = array<i64: 16, 32>}, {transform_indices = @transform_1, window_bounds = array<i64: 16, 32>}, {transform_indices = @transform_2, window_bounds = array<i64: 16, 32>}, {pipeline_mode = #tpu.pipeline_mode<synchronous>, transform_indices = @transform_3, window_bounds = array<i64: 4, 32, 8>}, {pipeline_mode = #tpu.pipeline_mode<synchronous>, transform_indices = @transform_4, window_bounds = array<i64: 4, 1, 8>}, {pipeline_mode = #tpu.pipeline_mode<synchronous>, transform_indices = @transform_5, window_bounds = array<i64: 4, 32, 8>}, {pipeline_mode = #tpu.pipeline_mode<synchronous>, transform_indices = @transform_6, window_bounds = array<i64: 4, 1, 8>}, {pipeline_mode = #tpu.pipeline_mode<synchronous>, transform_indices = @transform_7, window_bounds = array<i64: 4, 32, 8>}, {pipeline_mode = #tpu.pipeline_mode<synchronous>, transform_indices = @transform_8, window_bounds = array<i64: 4, 1, 8>}, {pipeline_mode = #tpu.pipeline_mode<synchronous>, transform_indices = @transform_9, window_bounds = array<i64: 4, 8, 32>}, {pipeline_mode = #tpu.pipeline_mode<synchronous>, transform_indices = @transform_10, window_bounds = array<i64: 1, 32>}, {transform_indices = @transform_11, window_bounds = array<i64: 16, 32>}]} {
    %c0 = arith.constant 0 : index
    %c0_0 = arith.constant 0 : index
    %0 = vector.load %arg1[%c0, %c0_0] : memref<16x32xbf16, #tpu.memory_space<vmem>>, vector<16x32xbf16>
    %c0_1 = arith.constant 0 : index
    %c0_2 = arith.constant 0 : index
    %1 = vector.load %arg2[%c0_1, %c0_2] : memref<16x32xbf16, #tpu.memory_space<vmem>>, vector<16x32xbf16>
    %c0_3 = arith.constant 0 : index
    %c0_4 = arith.constant 0 : index
    %2 = vector.load %arg3[%c0_3, %c0_4] : memref<16x32xbf16, #tpu.memory_space<vmem>>, vector<16x32xbf16>
    %cst = arith.constant 0.000000e+00 : f32
    %3 = vector.broadcast %cst : f32 to vector<16x32xf32>
    %c0_5 = arith.constant 0 : index
    %c0_6 = arith.constant 0 : index
    %c0_7 = arith.constant 0 : index
    %4 = vector.load %arg4[%c0_5, %c0_6, %c0_7] : memref<4x32x8xbf16, #tpu.memory_space<vmem>>, vector<1x32x8xbf16>
    %5 = vector.shape_cast %4 : vector<1x32x8xbf16> to vector<32x8xbf16>
    %cst_8 = arith.constant dense<0.000000e+00> : vector<16x8xf32>
    %6 = tpu.matmul %0, %5, %cst_8 {dimension_numbers = #tpu.dot_dimension_numbers<[1], [0], [0], [1], [0, 0, 1, 1], [], []>} : vector<16x32xbf16>, vector<32x8xbf16>, vector<16x8xf32> -> vector<16x8xf32>
    %c0_9 = arith.constant 0 : index
    %c0_10 = arith.constant 0 : index
    %c0_11 = arith.constant 0 : index
    %7 = vector.load %arg5[%c0_9, %c0_10, %c0_11] : memref<4x1x8xf32, #tpu.memory_space<vmem>>, vector<1x1x8xf32>
    %8 = vector.shape_cast %7 : vector<1x1x8xf32> to vector<1x8xf32>
    %9 = vector.broadcast %8 : vector<1x8xf32> to vector<16x8xf32>
    %10 = arith.addf %6, %9 : vector<16x8xf32>
    %cst_12 = arith.constant 0.353553385 : f32
    %11 = vector.broadcast %cst_12 : f32 to vector<16x8xf32>
    %12 = arith.mulf %10, %11 : vector<16x8xf32>
    %c0_13 = arith.constant 0 : index
    %c0_14 = arith.constant 0 : index
    %c0_15 = arith.constant 0 : index
    %13 = vector.load %arg6[%c0_13, %c0_14, %c0_15] : memref<4x32x8xbf16, #tpu.memory_space<vmem>>, vector<1x32x8xbf16>
    %14 = vector.shape_cast %13 : vector<1x32x8xbf16> to vector<32x8xbf16>
    %cst_16 = arith.constant dense<0.000000e+00> : vector<16x8xf32>
    %15 = tpu.matmul %1, %14, %cst_16 {dimension_numbers = #tpu.dot_dimension_numbers<[1], [0], [0], [1], [0, 0, 1, 1], [], []>} : vector<16x32xbf16>, vector<32x8xbf16>, vector<16x8xf32> -> vector<16x8xf32>
    %c0_17 = arith.constant 0 : index
    %c0_18 = arith.constant 0 : index
    %c0_19 = arith.constant 0 : index
    %16 = vector.load %arg7[%c0_17, %c0_18, %c0_19] : memref<4x1x8xf32, #tpu.memory_space<vmem>>, vector<1x1x8xf32>
    %17 = vector.shape_cast %16 : vector<1x1x8xf32> to vector<1x8xf32>
    %18 = vector.broadcast %17 : vector<1x8xf32> to vector<16x8xf32>
    %19 = arith.addf %15, %18 : vector<16x8xf32>
    %c0_20 = arith.constant 0 : index
    %c0_21 = arith.constant 0 : index
    %c0_22 = arith.constant 0 : index
    %20 = vector.load %arg8[%c0_20, %c0_21, %c0_22] : memref<4x32x8xbf16, #tpu.memory_space<vmem>>, vector<1x32x8xbf16>
    %21 = vector.shape_cast %20 : vector<1x32x8xbf16> to vector<32x8xbf16>
    %cst_23 = arith.constant dense<0.000000e+00> : vector<16x8xf32>
    %22 = tpu.matmul %2, %21, %cst_23 {dimension_numbers = #tpu.dot_dimension_numbers<[1], [0], [0], [1], [0, 0, 1, 1], [], []>} : vector<16x32xbf16>, vector<32x8xbf16>, vector<16x8xf32> -> vector<16x8xf32>
    %c0_24 = arith.constant 0 : index
    %c0_25 = arith.constant 0 : index
    %c0_26 = arith.constant 0 : index
    %23 = vector.load %arg9[%c0_24, %c0_25, %c0_26] : memref<4x1x8xf32, #tpu.memory_space<vmem>>, vector<1x1x8xf32>
    %24 = vector.shape_cast %23 : vector<1x1x8xf32> to vector<1x8xf32>
    %25 = vector.broadcast %24 : vector<1x8xf32> to vector<16x8xf32>
    %26 = arith.addf %22, %25 : vector<16x8xf32>
    %27 = arith.truncf %12 : vector<16x8xf32> to vector<16x8xbf16>
    %28 = vector.shape_cast %27 : vector<16x8xbf16> to vector<2x8x8xbf16>
    %29 = arith.truncf %19 : vector<16x8xf32> to vector<16x8xbf16>
    %30 = vector.shape_cast %29 : vector<16x8xbf16> to vector<2x8x8xbf16>
    %31 = arith.truncf %26 : vector<16x8xf32> to vector<16x8xbf16>
    %32 = vector.shape_cast %31 : vector<16x8xbf16> to vector<2x8x8xbf16>
    "tpu.trace_start"() <{level = 10 : i32, message = "bqd,bkd->bqk"}> : () -> ()
    %cst_27 = arith.constant dense<0.000000e+00> : vector<2x8x8xf32>
    %33 = tpu.matmul %28, %30, %cst_27 {dimension_numbers = #tpu.dot_dimension_numbers<[2], [2], [1], [1], [0, 0, 0, 1, 1, 1], [0], [0]>} : vector<2x8x8xbf16>, vector<2x8x8xbf16>, vector<2x8x8xf32> -> vector<2x8x8xf32>
    "tpu.trace_stop"() : () -> ()
    %cst_28 = arith.constant dense<0xFF800000> : vector<2x8xf32>
    %34 = vector.multi_reduction <maximumf>, %33, %cst_28 [2] : vector<2x8x8xf32> to vector<2x8xf32>
    %35 = vector.shape_cast %34 : vector<2x8xf32> to vector<2x8x1xf32>
    %36 = vector.broadcast %35 : vector<2x8x1xf32> to vector<2x8x8xf32>
    %37 = arith.subf %33, %36 : vector<2x8x8xf32>
    %38 = math.exp %37 : vector<2x8x8xf32>
    %cst_29 = arith.constant dense<0.000000e+00> : vector<2x8xf32>
    %39 = vector.multi_reduction <add>, %38, %cst_29 [2] : vector<2x8x8xf32> to vector<2x8xf32>
    %40 = vector.shape_cast %39 : vector<2x8xf32> to vector<2x8x1xf32>
    %41 = tpu.reciprocal %40 {approx = true} : vector<2x8x1xf32> -> vector<2x8x1xf32>
    %42 = arith.mulf %40, %41 : vector<2x8x1xf32>
    %cst_30 = arith.constant 2.000000e+00 : f32
    %43 = vector.broadcast %cst_30 : f32 to vector<2x8x1xf32>
    %44 = arith.subf %43, %42 : vector<2x8x1xf32>
    %45 = arith.mulf %41, %44 : vector<2x8x1xf32>
    %46 = vector.broadcast %45 : vector<2x8x1xf32> to vector<2x8x8xf32>
    %47 = arith.mulf %38, %46 : vector<2x8x8xf32>
    %48 = arith.truncf %47 : vector<2x8x8xf32> to vector<2x8x8xbf16>
    "tpu.trace_start"() <{level = 10 : i32, message = "bqk,bkd->bqd"}> : () -> ()
    %cst_31 = arith.constant dense<0.000000e+00> : vector<2x8x8xf32>
    %49 = tpu.matmul %48, %32, %cst_31 {dimension_numbers = #tpu.dot_dimension_numbers<[2], [1], [1], [2], [0, 0, 0, 1, 1, 2], [0], [0]>} : vector<2x8x8xbf16>, vector<2x8x8xbf16>, vector<2x8x8xf32> -> vector<2x8x8xf32>
    "tpu.trace_stop"() : () -> ()
    %50 = vector.shape_cast %49 : vector<2x8x8xf32> to vector<16x8xf32>
    %51 = arith.truncf %50 : vector<16x8xf32> to vector<16x8xbf16>
    %c0_32 = arith.constant 0 : index
    %c0_33 = arith.constant 0 : index
    %c0_34 = arith.constant 0 : index
    %52 = vector.load %arg10[%c0_32, %c0_33, %c0_34] : memref<4x8x32xbf16, #tpu.memory_space<vmem>>, vector<1x8x32xbf16>
    %53 = vector.shape_cast %52 : vector<1x8x32xbf16> to vector<8x32xbf16>
    %cst_35 = arith.constant dense<0.000000e+00> : vector<16x32xf32>
    %54 = tpu.matmul %51, %53, %cst_35 {dimension_numbers = #tpu.dot_dimension_numbers<[1], [0], [0], [1], [0, 0, 1, 1], [], []>} : vector<16x8xbf16>, vector<8x32xbf16>, vector<16x32xf32> -> vector<16x32xf32>
    %55 = arith.addf %3, %54 : vector<16x32xf32>
    %c1 = arith.constant 1 : index
    %c0_36 = arith.constant 0 : index
    %c0_37 = arith.constant 0 : index
    %56 = vector.load %arg4[%c1, %c0_36, %c0_37] : memref<4x32x8xbf16, #tpu.memory_space<vmem>>, vector<1x32x8xbf16>
    %57 = vector.shape_cast %56 : vector<1x32x8xbf16> to vector<32x8xbf16>
    %cst_38 = arith.constant dense<0.000000e+00> : vector<16x8xf32>
    %58 = tpu.matmul %0, %57, %cst_38 {dimension_numbers = #tpu.dot_dimension_numbers<[1], [0], [0], [1], [0, 0, 1, 1], [], []>} : vector<16x32xbf16>, vector<32x8xbf16>, vector<16x8xf32> -> vector<16x8xf32>
    %c1_39 = arith.constant 1 : index
    %c0_40 = arith.constant 0 : index
    %c0_41 = arith.constant 0 : index
    %59 = vector.load %arg5[%c1_39, %c0_40, %c0_41] : memref<4x1x8xf32, #tpu.memory_space<vmem>>, vector<1x1x8xf32>
    %60 = vector.shape_cast %59 : vector<1x1x8xf32> to vector<1x8xf32>
    %61 = vector.broadcast %60 : vector<1x8xf32> to vector<16x8xf32>
    %62 = arith.addf %58, %61 : vector<16x8xf32>
    %cst_42 = arith.constant 0.353553385 : f32
    %63 = vector.broadcast %cst_42 : f32 to vector<16x8xf32>
    %64 = arith.mulf %62, %63 : vector<16x8xf32>
    %c1_43 = arith.constant 1 : index
    %c0_44 = arith.constant 0 : index
    %c0_45 = arith.constant 0 : index
    %65 = vector.load %arg6[%c1_43, %c0_44, %c0_45] : memref<4x32x8xbf16, #tpu.memory_space<vmem>>, vector<1x32x8xbf16>
    %66 = vector.shape_cast %65 : vector<1x32x8xbf16> to vector<32x8xbf16>
    %cst_46 = arith.constant dense<0.000000e+00> : vector<16x8xf32>
    %67 = tpu.matmul %1, %66, %cst_46 {dimension_numbers = #tpu.dot_dimension_numbers<[1], [0], [0], [1], [0, 0, 1, 1], [], []>} : vector<16x32xbf16>, vector<32x8xbf16>, vector<16x8xf32> -> vector<16x8xf32>
    %c1_47 = arith.constant 1 : index
    %c0_48 = arith.constant 0 : index
    %c0_49 = arith.constant 0 : index
    %68 = vector.load %arg7[%c1_47, %c0_48, %c0_49] : memref<4x1x8xf32, #tpu.memory_space<vmem>>, vector<1x1x8xf32>
    %69 = vector.shape_cast %68 : vector<1x1x8xf32> to vector<1x8xf32>
    %70 = vector.broadcast %69 : vector<1x8xf32> to vector<16x8xf32>
    %71 = arith.addf %67, %70 : vector<16x8xf32>
    %c1_50 = arith.constant 1 : index
    %c0_51 = arith.constant 0 : index
    %c0_52 = arith.constant 0 : index
    %72 = vector.load %arg8[%c1_50, %c0_51, %c0_52] : memref<4x32x8xbf16, #tpu.memory_space<vmem>>, vector<1x32x8xbf16>
    %73 = vector.shape_cast %72 : vector<1x32x8xbf16> to vector<32x8xbf16>
    %cst_53 = arith.constant dense<0.000000e+00> : vector<16x8xf32>
    %74 = tpu.matmul %2, %73, %cst_53 {dimension_numbers = #tpu.dot_dimension_numbers<[1], [0], [0], [1], [0, 0, 1, 1], [], []>} : vector<16x32xbf16>, vector<32x8xbf16>, vector<16x8xf32> -> vector<16x8xf32>
    %c1_54 = arith.constant 1 : index
    %c0_55 = arith.constant 0 : index
    %c0_56 = arith.constant 0 : index
    %75 = vector.load %arg9[%c1_54, %c0_55, %c0_56] : memref<4x1x8xf32, #tpu.memory_space<vmem>>, vector<1x1x8xf32>
    %76 = vector.shape_cast %75 : vector<1x1x8xf32> to vector<1x8xf32>
    %77 = vector.broadcast %76 : vector<1x8xf32> to vector<16x8xf32>
    %78 = arith.addf %74, %77 : vector<16x8xf32>
    %79 = arith.truncf %64 : vector<16x8xf32> to vector<16x8xbf16>
    %80 = vector.shape_cast %79 : vector<16x8xbf16> to vector<2x8x8xbf16>
    %81 = arith.truncf %71 : vector<16x8xf32> to vector<16x8xbf16>
    %82 = vector.shape_cast %81 : vector<16x8xbf16> to vector<2x8x8xbf16>
    %83 = arith.truncf %78 : vector<16x8xf32> to vector<16x8xbf16>
    %84 = vector.shape_cast %83 : vector<16x8xbf16> to vector<2x8x8xbf16>
    "tpu.trace_start"() <{level = 10 : i32, message = "bqd,bkd->bqk"}> : () -> ()
    %cst_57 = arith.constant dense<0.000000e+00> : vector<2x8x8xf32>
    %85 = tpu.matmul %80, %82, %cst_57 {dimension_numbers = #tpu.dot_dimension_numbers<[2], [2], [1], [1], [0, 0, 0, 1, 1, 1], [0], [0]>} : vector<2x8x8xbf16>, vector<2x8x8xbf16>, vector<2x8x8xf32> -> vector<2x8x8xf32>
    "tpu.trace_stop"() : () -> ()
    %cst_58 = arith.constant dense<0xFF800000> : vector<2x8xf32>
    %86 = vector.multi_reduction <maximumf>, %85, %cst_58 [2] : vector<2x8x8xf32> to vector<2x8xf32>
    %87 = vector.shape_cast %86 : vector<2x8xf32> to vector<2x8x1xf32>
    %88 = vector.broadcast %87 : vector<2x8x1xf32> to vector<2x8x8xf32>
    %89 = arith.subf %85, %88 : vector<2x8x8xf32>
    %90 = math.exp %89 : vector<2x8x8xf32>
    %cst_59 = arith.constant dense<0.000000e+00> : vector<2x8xf32>
    %91 = vector.multi_reduction <add>, %90, %cst_59 [2] : vector<2x8x8xf32> to vector<2x8xf32>
    %92 = vector.shape_cast %91 : vector<2x8xf32> to vector<2x8x1xf32>
    %93 = tpu.reciprocal %92 {approx = true} : vector<2x8x1xf32> -> vector<2x8x1xf32>
    %94 = arith.mulf %92, %93 : vector<2x8x1xf32>
    %cst_60 = arith.constant 2.000000e+00 : f32
    %95 = vector.broadcast %cst_60 : f32 to vector<2x8x1xf32>
    %96 = arith.subf %95, %94 : vector<2x8x1xf32>
    %97 = arith.mulf %93, %96 : vector<2x8x1xf32>
    %98 = vector.broadcast %97 : vector<2x8x1xf32> to vector<2x8x8xf32>
    %99 = arith.mulf %90, %98 : vector<2x8x8xf32>
    %100 = arith.truncf %99 : vector<2x8x8xf32> to vector<2x8x8xbf16>
    "tpu.trace_start"() <{level = 10 : i32, message = "bqk,bkd->bqd"}> : () -> ()
    %cst_61 = arith.constant dense<0.000000e+00> : vector<2x8x8xf32>
    %101 = tpu.matmul %100, %84, %cst_61 {dimension_numbers = #tpu.dot_dimension_numbers<[2], [1], [1], [2], [0, 0, 0, 1, 1, 2], [0], [0]>} : vector<2x8x8xbf16>, vector<2x8x8xbf16>, vector<2x8x8xf32> -> vector<2x8x8xf32>
    "tpu.trace_stop"() : () -> ()
    %102 = vector.shape_cast %101 : vector<2x8x8xf32> to vector<16x8xf32>
    %103 = arith.truncf %102 : vector<16x8xf32> to vector<16x8xbf16>
    %c1_62 = arith.constant 1 : index
    %c0_63 = arith.constant 0 : index
    %c0_64 = arith.constant 0 : index
    %104 = vector.load %arg10[%c1_62, %c0_63, %c0_64] : memref<4x8x32xbf16, #tpu.memory_space<vmem>>, vector<1x8x32xbf16>
    %105 = vector.shape_cast %104 : vector<1x8x32xbf16> to vector<8x32xbf16>
    %cst_65 = arith.constant dense<0.000000e+00> : vector<16x32xf32>
    %106 = tpu.matmul %103, %105, %cst_65 {dimension_numbers = #tpu.dot_dimension_numbers<[1], [0], [0], [1], [0, 0, 1, 1], [], []>} : vector<16x8xbf16>, vector<8x32xbf16>, vector<16x32xf32> -> vector<16x32xf32>
    %107 = arith.addf %55, %106 : vector<16x32xf32>
    %c2 = arith.constant 2 : index
    %c0_66 = arith.constant 0 : index
    %c0_67 = arith.constant 0 : index
    %108 = vector.load %arg4[%c2, %c0_66, %c0_67] : memref<4x32x8xbf16, #tpu.memory_space<vmem>>, vector<1x32x8xbf16>
    %109 = vector.shape_cast %108 : vector<1x32x8xbf16> to vector<32x8xbf16>
    %cst_68 = arith.constant dense<0.000000e+00> : vector<16x8xf32>
    %110 = tpu.matmul %0, %109, %cst_68 {dimension_numbers = #tpu.dot_dimension_numbers<[1], [0], [0], [1], [0, 0, 1, 1], [], []>} : vector<16x32xbf16>, vector<32x8xbf16>, vector<16x8xf32> -> vector<16x8xf32>
    %c2_69 = arith.constant 2 : index
    %c0_70 = arith.constant 0 : index
    %c0_71 = arith.constant 0 : index
    %111 = vector.load %arg5[%c2_69, %c0_70, %c0_71] : memref<4x1x8xf32, #tpu.memory_space<vmem>>, vector<1x1x8xf32>
    %112 = vector.shape_cast %111 : vector<1x1x8xf32> to vector<1x8xf32>
    %113 = vector.broadcast %112 : vector<1x8xf32> to vector<16x8xf32>
    %114 = arith.addf %110, %113 : vector<16x8xf32>
    %cst_72 = arith.constant 0.353553385 : f32
    %115 = vector.broadcast %cst_72 : f32 to vector<16x8xf32>
    %116 = arith.mulf %114, %115 : vector<16x8xf32>
    %c2_73 = arith.constant 2 : index
    %c0_74 = arith.constant 0 : index
    %c0_75 = arith.constant 0 : index
    %117 = vector.load %arg6[%c2_73, %c0_74, %c0_75] : memref<4x32x8xbf16, #tpu.memory_space<vmem>>, vector<1x32x8xbf16>
    %118 = vector.shape_cast %117 : vector<1x32x8xbf16> to vector<32x8xbf16>
    %cst_76 = arith.constant dense<0.000000e+00> : vector<16x8xf32>
    %119 = tpu.matmul %1, %118, %cst_76 {dimension_numbers = #tpu.dot_dimension_numbers<[1], [0], [0], [1], [0, 0, 1, 1], [], []>} : vector<16x32xbf16>, vector<32x8xbf16>, vector<16x8xf32> -> vector<16x8xf32>
    %c2_77 = arith.constant 2 : index
    %c0_78 = arith.constant 0 : index
    %c0_79 = arith.constant 0 : index
    %120 = vector.load %arg7[%c2_77, %c0_78, %c0_79] : memref<4x1x8xf32, #tpu.memory_space<vmem>>, vector<1x1x8xf32>
    %121 = vector.shape_cast %120 : vector<1x1x8xf32> to vector<1x8xf32>
    %122 = vector.broadcast %121 : vector<1x8xf32> to vector<16x8xf32>
    %123 = arith.addf %119, %122 : vector<16x8xf32>
    %c2_80 = arith.constant 2 : index
    %c0_81 = arith.constant 0 : index
    %c0_82 = arith.constant 0 : index
    %124 = vector.load %arg8[%c2_80, %c0_81, %c0_82] : memref<4x32x8xbf16, #tpu.memory_space<vmem>>, vector<1x32x8xbf16>
    %125 = vector.shape_cast %124 : vector<1x32x8xbf16> to vector<32x8xbf16>
    %cst_83 = arith.constant dense<0.000000e+00> : vector<16x8xf32>
    %126 = tpu.matmul %2, %125, %cst_83 {dimension_numbers = #tpu.dot_dimension_numbers<[1], [0], [0], [1], [0, 0, 1, 1], [], []>} : vector<16x32xbf16>, vector<32x8xbf16>, vector<16x8xf32> -> vector<16x8xf32>
    %c2_84 = arith.constant 2 : index
    %c0_85 = arith.constant 0 : index
    %c0_86 = arith.constant 0 : index
    %127 = vector.load %arg9[%c2_84, %c0_85, %c0_86] : memref<4x1x8xf32, #tpu.memory_space<vmem>>, vector<1x1x8xf32>
    %128 = vector.shape_cast %127 : vector<1x1x8xf32> to vector<1x8xf32>
    %129 = vector.broadcast %128 : vector<1x8xf32> to vector<16x8xf32>
    %130 = arith.addf %126, %129 : vector<16x8xf32>
    %131 = arith.truncf %116 : vector<16x8xf32> to vector<16x8xbf16>
    %132 = vector.shape_cast %131 : vector<16x8xbf16> to vector<2x8x8xbf16>
    %133 = arith.truncf %123 : vector<16x8xf32> to vector<16x8xbf16>
    %134 = vector.shape_cast %133 : vector<16x8xbf16> to vector<2x8x8xbf16>
    %135 = arith.truncf %130 : vector<16x8xf32> to vector<16x8xbf16>
    %136 = vector.shape_cast %135 : vector<16x8xbf16> to vector<2x8x8xbf16>
    "tpu.trace_start"() <{level = 10 : i32, message = "bqd,bkd->bqk"}> : () -> ()
    %cst_87 = arith.constant dense<0.000000e+00> : vector<2x8x8xf32>
    %137 = tpu.matmul %132, %134, %cst_87 {dimension_numbers = #tpu.dot_dimension_numbers<[2], [2], [1], [1], [0, 0, 0, 1, 1, 1], [0], [0]>} : vector<2x8x8xbf16>, vector<2x8x8xbf16>, vector<2x8x8xf32> -> vector<2x8x8xf32>
    "tpu.trace_stop"() : () -> ()
    %cst_88 = arith.constant dense<0xFF800000> : vector<2x8xf32>
    %138 = vector.multi_reduction <maximumf>, %137, %cst_88 [2] : vector<2x8x8xf32> to vector<2x8xf32>
    %139 = vector.shape_cast %138 : vector<2x8xf32> to vector<2x8x1xf32>
    %140 = vector.broadcast %139 : vector<2x8x1xf32> to vector<2x8x8xf32>
    %141 = arith.subf %137, %140 : vector<2x8x8xf32>
    %142 = math.exp %141 : vector<2x8x8xf32>
    %cst_89 = arith.constant dense<0.000000e+00> : vector<2x8xf32>
    %143 = vector.multi_reduction <add>, %142, %cst_89 [2] : vector<2x8x8xf32> to vector<2x8xf32>
    %144 = vector.shape_cast %143 : vector<2x8xf32> to vector<2x8x1xf32>
    %145 = tpu.reciprocal %144 {approx = true} : vector<2x8x1xf32> -> vector<2x8x1xf32>
    %146 = arith.mulf %144, %145 : vector<2x8x1xf32>
    %cst_90 = arith.constant 2.000000e+00 : f32
    %147 = vector.broadcast %cst_90 : f32 to vector<2x8x1xf32>
    %148 = arith.subf %147, %146 : vector<2x8x1xf32>
    %149 = arith.mulf %145, %148 : vector<2x8x1xf32>
    %150 = vector.broadcast %149 : vector<2x8x1xf32> to vector<2x8x8xf32>
    %151 = arith.mulf %142, %150 : vector<2x8x8xf32>
    %152 = arith.truncf %151 : vector<2x8x8xf32> to vector<2x8x8xbf16>
    "tpu.trace_start"() <{level = 10 : i32, message = "bqk,bkd->bqd"}> : () -> ()
    %cst_91 = arith.constant dense<0.000000e+00> : vector<2x8x8xf32>
    %153 = tpu.matmul %152, %136, %cst_91 {dimension_numbers = #tpu.dot_dimension_numbers<[2], [1], [1], [2], [0, 0, 0, 1, 1, 2], [0], [0]>} : vector<2x8x8xbf16>, vector<2x8x8xbf16>, vector<2x8x8xf32> -> vector<2x8x8xf32>
    "tpu.trace_stop"() : () -> ()
    %154 = vector.shape_cast %153 : vector<2x8x8xf32> to vector<16x8xf32>
    %155 = arith.truncf %154 : vector<16x8xf32> to vector<16x8xbf16>
    %c2_92 = arith.constant 2 : index
    %c0_93 = arith.constant 0 : index
    %c0_94 = arith.constant 0 : index
    %156 = vector.load %arg10[%c2_92, %c0_93, %c0_94] : memref<4x8x32xbf16, #tpu.memory_space<vmem>>, vector<1x8x32xbf16>
    %157 = vector.shape_cast %156 : vector<1x8x32xbf16> to vector<8x32xbf16>
    %cst_95 = arith.constant dense<0.000000e+00> : vector<16x32xf32>
    %158 = tpu.matmul %155, %157, %cst_95 {dimension_numbers = #tpu.dot_dimension_numbers<[1], [0], [0], [1], [0, 0, 1, 1], [], []>} : vector<16x8xbf16>, vector<8x32xbf16>, vector<16x32xf32> -> vector<16x32xf32>
    %159 = arith.addf %107, %158 : vector<16x32xf32>
    %c3 = arith.constant 3 : index
    %c0_96 = arith.constant 0 : index
    %c0_97 = arith.constant 0 : index
    %160 = vector.load %arg4[%c3, %c0_96, %c0_97] : memref<4x32x8xbf16, #tpu.memory_space<vmem>>, vector<1x32x8xbf16>
    %161 = vector.shape_cast %160 : vector<1x32x8xbf16> to vector<32x8xbf16>
    %cst_98 = arith.constant dense<0.000000e+00> : vector<16x8xf32>
    %162 = tpu.matmul %0, %161, %cst_98 {dimension_numbers = #tpu.dot_dimension_numbers<[1], [0], [0], [1], [0, 0, 1, 1], [], []>} : vector<16x32xbf16>, vector<32x8xbf16>, vector<16x8xf32> -> vector<16x8xf32>
    %c3_99 = arith.constant 3 : index
    %c0_100 = arith.constant 0 : index
    %c0_101 = arith.constant 0 : index
    %163 = vector.load %arg5[%c3_99, %c0_100, %c0_101] : memref<4x1x8xf32, #tpu.memory_space<vmem>>, vector<1x1x8xf32>
    %164 = vector.shape_cast %163 : vector<1x1x8xf32> to vector<1x8xf32>
    %165 = vector.broadcast %164 : vector<1x8xf32> to vector<16x8xf32>
    %166 = arith.addf %162, %165 : vector<16x8xf32>
    %cst_102 = arith.constant 0.353553385 : f32
    %167 = vector.broadcast %cst_102 : f32 to vector<16x8xf32>
    %168 = arith.mulf %166, %167 : vector<16x8xf32>
    %c3_103 = arith.constant 3 : index
    %c0_104 = arith.constant 0 : index
    %c0_105 = arith.constant 0 : index
    %169 = vector.load %arg6[%c3_103, %c0_104, %c0_105] : memref<4x32x8xbf16, #tpu.memory_space<vmem>>, vector<1x32x8xbf16>
    %170 = vector.shape_cast %169 : vector<1x32x8xbf16> to vector<32x8xbf16>
    %cst_106 = arith.constant dense<0.000000e+00> : vector<16x8xf32>
    %171 = tpu.matmul %1, %170, %cst_106 {dimension_numbers = #tpu.dot_dimension_numbers<[1], [0], [0], [1], [0, 0, 1, 1], [], []>} : vector<16x32xbf16>, vector<32x8xbf16>, vector<16x8xf32> -> vector<16x8xf32>
    %c3_107 = arith.constant 3 : index
    %c0_108 = arith.constant 0 : index
    %c0_109 = arith.constant 0 : index
    %172 = vector.load %arg7[%c3_107, %c0_108, %c0_109] : memref<4x1x8xf32, #tpu.memory_space<vmem>>, vector<1x1x8xf32>
    %173 = vector.shape_cast %172 : vector<1x1x8xf32> to vector<1x8xf32>
    %174 = vector.broadcast %173 : vector<1x8xf32> to vector<16x8xf32>
    %175 = arith.addf %171, %174 : vector<16x8xf32>
    %c3_110 = arith.constant 3 : index
    %c0_111 = arith.constant 0 : index
    %c0_112 = arith.constant 0 : index
    %176 = vector.load %arg8[%c3_110, %c0_111, %c0_112] : memref<4x32x8xbf16, #tpu.memory_space<vmem>>, vector<1x32x8xbf16>
    %177 = vector.shape_cast %176 : vector<1x32x8xbf16> to vector<32x8xbf16>
    %cst_113 = arith.constant dense<0.000000e+00> : vector<16x8xf32>
    %178 = tpu.matmul %2, %177, %cst_113 {dimension_numbers = #tpu.dot_dimension_numbers<[1], [0], [0], [1], [0, 0, 1, 1], [], []>} : vector<16x32xbf16>, vector<32x8xbf16>, vector<16x8xf32> -> vector<16x8xf32>
    %c3_114 = arith.constant 3 : index
    %c0_115 = arith.constant 0 : index
    %c0_116 = arith.constant 0 : index
    %179 = vector.load %arg9[%c3_114, %c0_115, %c0_116] : memref<4x1x8xf32, #tpu.memory_space<vmem>>, vector<1x1x8xf32>
    %180 = vector.shape_cast %179 : vector<1x1x8xf32> to vector<1x8xf32>
    %181 = vector.broadcast %180 : vector<1x8xf32> to vector<16x8xf32>
    %182 = arith.addf %178, %181 : vector<16x8xf32>
    %183 = arith.truncf %168 : vector<16x8xf32> to vector<16x8xbf16>
    %184 = vector.shape_cast %183 : vector<16x8xbf16> to vector<2x8x8xbf16>
    %185 = arith.truncf %175 : vector<16x8xf32> to vector<16x8xbf16>
    %186 = vector.shape_cast %185 : vector<16x8xbf16> to vector<2x8x8xbf16>
    %187 = arith.truncf %182 : vector<16x8xf32> to vector<16x8xbf16>
    %188 = vector.shape_cast %187 : vector<16x8xbf16> to vector<2x8x8xbf16>
    "tpu.trace_start"() <{level = 10 : i32, message = "bqd,bkd->bqk"}> : () -> ()
    %cst_117 = arith.constant dense<0.000000e+00> : vector<2x8x8xf32>
    %189 = tpu.matmul %184, %186, %cst_117 {dimension_numbers = #tpu.dot_dimension_numbers<[2], [2], [1], [1], [0, 0, 0, 1, 1, 1], [0], [0]>} : vector<2x8x8xbf16>, vector<2x8x8xbf16>, vector<2x8x8xf32> -> vector<2x8x8xf32>
    "tpu.trace_stop"() : () -> ()
    %cst_118 = arith.constant dense<0xFF800000> : vector<2x8xf32>
    %190 = vector.multi_reduction <maximumf>, %189, %cst_118 [2] : vector<2x8x8xf32> to vector<2x8xf32>
    %191 = vector.shape_cast %190 : vector<2x8xf32> to vector<2x8x1xf32>
    %192 = vector.broadcast %191 : vector<2x8x1xf32> to vector<2x8x8xf32>
    %193 = arith.subf %189, %192 : vector<2x8x8xf32>
    %194 = math.exp %193 : vector<2x8x8xf32>
    %cst_119 = arith.constant dense<0.000000e+00> : vector<2x8xf32>
    %195 = vector.multi_reduction <add>, %194, %cst_119 [2] : vector<2x8x8xf32> to vector<2x8xf32>
    %196 = vector.shape_cast %195 : vector<2x8xf32> to vector<2x8x1xf32>
    %197 = tpu.reciprocal %196 {approx = true} : vector<2x8x1xf32> -> vector<2x8x1xf32>
    %198 = arith.mulf %196, %197 : vector<2x8x1xf32>
    %cst_120 = arith.constant 2.000000e+00 : f32
    %199 = vector.broadcast %cst_120 : f32 to vector<2x8x1xf32>
    %200 = arith.subf %199, %198 : vector<2x8x1xf32>
    %201 = arith.mulf %197, %200 : vector<2x8x1xf32>
    %202 = vector.broadcast %201 : vector<2x8x1xf32> to vector<2x8x8xf32>
    %203 = arith.mulf %194, %202 : vector<2x8x8xf32>
    %204 = arith.truncf %203 : vector<2x8x8xf32> to vector<2x8x8xbf16>
    "tpu.trace_start"() <{level = 10 : i32, message = "bqk,bkd->bqd"}> : () -> ()
    %cst_121 = arith.constant dense<0.000000e+00> : vector<2x8x8xf32>
    %205 = tpu.matmul %204, %188, %cst_121 {dimension_numbers = #tpu.dot_dimension_numbers<[2], [1], [1], [2], [0, 0, 0, 1, 1, 2], [0], [0]>} : vector<2x8x8xbf16>, vector<2x8x8xbf16>, vector<2x8x8xf32> -> vector<2x8x8xf32>
    "tpu.trace_stop"() : () -> ()
    %206 = vector.shape_cast %205 : vector<2x8x8xf32> to vector<16x8xf32>
    %207 = arith.truncf %206 : vector<16x8xf32> to vector<16x8xbf16>
    %c3_122 = arith.constant 3 : index
    %c0_123 = arith.constant 0 : index
    %c0_124 = arith.constant 0 : index
    %208 = vector.load %arg10[%c3_122, %c0_123, %c0_124] : memref<4x8x32xbf16, #tpu.memory_space<vmem>>, vector<1x8x32xbf16>
    %209 = vector.shape_cast %208 : vector<1x8x32xbf16> to vector<8x32xbf16>
    %cst_125 = arith.constant dense<0.000000e+00> : vector<16x32xf32>
    %210 = tpu.matmul %207, %209, %cst_125 {dimension_numbers = #tpu.dot_dimension_numbers<[1], [0], [0], [1], [0, 0, 1, 1], [], []>} : vector<16x8xbf16>, vector<8x32xbf16>, vector<16x32xf32> -> vector<16x32xf32>
    %211 = arith.addf %159, %210 : vector<16x32xf32>
    %c0_126 = arith.constant 0 : index
    %c0_127 = arith.constant 0 : index
    %212 = vector.load %arg11[%c0_126, %c0_127] : memref<1x32xf32, #tpu.memory_space<vmem>>, vector<1x32xf32>
    %213 = vector.broadcast %212 : vector<1x32xf32> to vector<16x32xf32>
    %214 = arith.addf %211, %213 : vector<16x32xf32>
    %c0_128 = arith.constant 0 : index
    %c0_129 = arith.constant 0 : index
    %215 = vector.load %arg12[%c0_128, %c0_129] : memref<16x32xf32, #tpu.memory_space<vmem>>, vector<16x32xf32>
    tpu.vector_store %arg12[%c0_128, %c0_129], %214 {strides = array<i32>} : memref<16x32xf32, #tpu.memory_space<vmem>>, vector<16x32xf32>,
    return
  }
  func.func @transform_0(%arg0: i32) -> (i32, i32) {
    %c0_i32 = arith.constant 0 : i32
    %c0_i32_0 = arith.constant 0 : i32
    return %arg0, %c0_i32 : i32, i32
  }
  func.func @transform_1(%arg0: i32) -> (i32, i32) {
    %c0_i32 = arith.constant 0 : i32
    %c0_i32_0 = arith.constant 0 : i32
    return %arg0, %c0_i32 : i32, i32
  }
  func.func @transform_2(%arg0: i32) -> (i32, i32) {
    %c0_i32 = arith.constant 0 : i32
    %c0_i32_0 = arith.constant 0 : i32
    return %arg0, %c0_i32 : i32, i32
  }
  func.func @transform_3(%arg0: i32) -> (i32, i32, i32) {
    %c0_i32 = arith.constant 0 : i32
    %c0_i32_0 = arith.constant 0 : i32
    %c0_i32_1 = arith.constant 0 : i32
    %c0_i32_2 = arith.constant 0 : i32
    return %c0_i32, %c0_i32_0, %c0_i32_1 : i32, i32, i32
  }
  func.func @transform_4(%arg0: i32) -> (i32, i32, i32) {
    %c0_i32 = arith.constant 0 : i32
    %c0_i32_0 = arith.constant 0 : i32
    %c0_i32_1 = arith.constant 0 : i32
    %c0_i32_2 = arith.constant 0 : i32
    return %c0_i32, %c0_i32_0, %c0_i32_1 : i32, i32, i32
  }
  func.func @transform_5(%arg0: i32) -> (i32, i32, i32) {
    %c0_i32 = arith.constant 0 : i32
    %c0_i32_0 = arith.constant 0 : i32
    %c0_i32_1 = arith.constant 0 : i32
    %c0_i32_2 = arith.constant 0 : i32
    return %c0_i32, %c0_i32_0, %c0_i32_1 : i32, i32, i32
  }
  func.func @transform_6(%arg0: i32) -> (i32, i32, i32) {
    %c0_i32 = arith.constant 0 : i32
    %c0_i32_0 = arith.constant 0 : i32
    %c0_i32_1 = arith.constant 0 : i32
    %c0_i32_2 = arith.constant 0 : i32
    return %c0_i32, %c0_i32_0, %c0_i32_1 : i32, i32, i32
  }
  func.func @transform_7(%arg0: i32) -> (i32, i32, i32) {
    %c0_i32 = arith.constant 0 : i32
    %c0_i32_0 = arith.constant 0 : i32
    %c0_i32_1 = arith.constant 0 : i32
    %c0_i32_2 = arith.constant 0 : i32
    return %c0_i32, %c0_i32_0, %c0_i32_1 : i32, i32, i32
  }
  func.func @transform_8(%arg0: i32) -> (i32, i32, i32) {
    %c0_i32 = arith.constant 0 : i32
    %c0_i32_0 = arith.constant 0 : i32
    %c0_i32_1 = arith.constant 0 : i32
    %c0_i32_2 = arith.constant 0 : i32
    return %c0_i32, %c0_i32_0, %c0_i32_1 : i32, i32, i32
  }
  func.func @transform_9(%arg0: i32) -> (i32, i32, i32) {
    %c0_i32 = arith.constant 0 : i32
    %c0_i32_0 = arith.constant 0 : i32
    %c0_i32_1 = arith.constant 0 : i32
    %c0_i32_2 = arith.constant 0 : i32
    return %c0_i32, %c0_i32_0, %c0_i32_1 : i32, i32, i32
  }
  func.func @transform_10(%arg0: i32) -> (i32, i32) {
    %c0_i32 = arith.constant 0 : i32
    %c0_i32_0 = arith.constant 0 : i32
    %c0_i32_1 = arith.constant 0 : i32
    return %c0_i32, %c0_i32_0 : i32, i32
  }
  func.func @transform_11(%arg0: i32) -> (i32, i32) {
    %c0_i32 = arith.constant 0 : i32
    %c0_i32_0 = arith.constant 0 : i32
    return %arg0, %c0_i32 : i32, i32
  }
}

</mosaic_0001>

<bundles_post_ra>
// kernel: tpu_custom_call.1
= control target key start
LH: loop header
LB: loop body
LE: loop exit
PB: predicated region body
PF: predicated region fallthrough
CT: control target
= control target key end

     0   :  { %vm71_vm0 = vcmask 261120   ;;  %s1672_s0 = inlined_call_operand.vmem [shape: bf16[16,32], index: 0, kind: input, shape index: {}]   ;;  %s1673_s1 = inlined_call_operand.vmem [shape: bf16[16,32], index: 1, kind: input, shape index: {}]   ;;  %s1674_s2 = inlined_call_operand.vmem [shape: bf16[16,32], index: 2, kind: input, shape index: {}]   ;;  %s1675_s3 = inlined_call_operand.vmem [shape: bf16[4,32,8], index: 3, kind: input, shape index: {}]   ;;  %s1676_s4 = inlined_call_operand.vmem [shape: f32[4,1,8], index: 4, kind: input, shape index: {}]   ;;  %s1677_s5 = inlined_call_operand.vmem [shape: bf16[4,32,8], index: 5, kind: input, shape index: {}]   ;;  %s1678_s6 = inlined_call_operand.vmem [shape: f32[4,1,8], index: 6, kind: input, shape index: {}]   ;;  %s1679_s7 = inlined_call_operand.vmem [shape: bf16[4,32,8], index: 7, kind: input, shape index: {}]   ;;  %s1680_s8 = inlined_call_operand.vmem [shape: f32[4,1,8], index: 8, kind: input, shape index: {}]   ;;  %s1681_s9 = inlined_call_operand.vmem [shape: bf16[4,8,32], index: 9, kind: input, shape index: {}]   ;;  %s1682_s10 = inlined_call_operand.vmem [shape: f32[1,32], index: 10, kind: input, shape index: {}]   ;;  %s1683_s11 = inlined_call_operand.hbm [shape: f32[16,32], index: 11, kind: output, shape index: {}]  }
   0x1   :  { %v1268_v0 = vld [vmem:[%s1675_s3 + $0x8] sm:$0xff]  ;;  %v1267_v2 = vld [vmem:[%s1675_s3] sm:$0xff] }
   0x2   :  { %v1270_v1 = vld [vmem:[%s1677_s5 + $0x8] sm:$0xff]  ;;  %81 = vmatpush.bf16.msra.mxu0 %v1268_v0  ;;  %v1269_v3 = vld [vmem:[%s1677_s5] sm:$0xff] }
   0x3   :  { %125 = vmatpush.bf16.msra.mxu1 %v1270_v1  ;;  %v1443_v4 = vld [vmem:[%s1672_s0] sm:$0xff] }
   0x4   :  { %v1448_v5 = vld [vmem:[%s1673_s1] sm:$0xff] }
   0x6   :  { %82 = vmatpush.bf16.msra.mxu0 %v1267_v2 }
   0x7   :  { %126 = vmatpush.bf16.msra.mxu1 %v1269_v3 }
   0x8   :  { %16 = vsyncpa [#allocation3], 0  ;;  %v1294_v6 = vld [vmem:[%s1676_s4] ss:$0 sm:$0xff]  ;;  %vm181_vm1 = vcmask 64512   ;;  %v1274_v13 = vld [vmem:[%s1675_s3 + $0x18] sm:$0xff] }
   0x9   :  { %1088 = vmatmul.msk.bf16.vlgmr.msra.gmra.mxu0 %vm71_vm0, %v1443_v4  ;;  %v1295_v7 = vld [vmem:[%s1678_s6] ss:$0 sm:$0xff]  ;;  %v1273_v16 = vld [vmem:[%s1675_s3 + $0x10] sm:$0xff]  ;;  %v1276_v23 = vld [vmem:[%s1677_s5 + $0x18] sm:$0xff]  ;;  %vm253_vm2 = vcmask 1043456   ;;  %s1064_s15 = sshll.u32 %s1683_s11, 4  ;;  %s1065_s15 = int_to_ptr.hbm [resolvable:$true] %s1064_s15 }
   0xa   :  { %1101 = vmatmul.msk.bf16.vlgmr.msra.gmra.mxu1 %vm71_vm0, %v1448_v5  ;;  %v1275_v26 = vld [vmem:[%s1677_s5 + $0x10] sm:$0xff]  ;;  %v1272_v32 = vld [vmem:[%s1679_s7 + $0x8] sm:$0xff]  ;;  %v1271_v34 = vld [vmem:[%s1679_s7] sm:$0xff]  ;;  %s1367_s16 = smov 8  }
   0xb   :  { %167 = vmatpush.bf16.msra.mxu2 %v1272_v32  ;;  %v1491_v36 = vld [vmem:[%s1674_s2] sm:$0xff] }
   0xc   :  { %v1297_v37 = vld [vmem:[%s1676_s4 + $0x1] ss:$0 sm:$0xff]  ;;  %v1298_v1 = vld [vmem:[%s1680_s8] ss:$0 sm:$0xff] }
   0xd   :  { %v1296_v39 = vld [vmem:[%s1678_s6 + $0x1] ss:$0 sm:$0xff] }
   0xf   :  { %168 = vmatpush.bf16.msra.mxu2 %v1271_v34 }
  0x12   :  { %1114 = vmatmul.msk.bf16.vlgmr.msra.gmra.mxu2 %vm71_vm0, %v1491_v36 }
  0x86   :  { %v84_v8 = vpop.f32.mrf.mxu0 }
  0x87   :  { %v128_v9 = vpop.f32.mrf.mxu1  ;;  %v85_v10 = vadd.f32 %v1294_v6, %v84_v8 }
  0x88   :  { %v129_v11 = vadd.f32 %v1295_v7, %v128_v9 }
  0x89   :  { %v89_v14 = vmul.f32 0.35355338, %v85_v10 }
  0x8a   :  { %v177_v12 = vpack.c.bf16 %v129_v11, %v129_v11 }
  0x8b   :  { %v175_v19 = vpack.c.bf16 %v89_v14, %v89_v14 }
  0x8c   :  { %v186_v15 = vsel %vm181_vm1, %v177_v12, 0 }
  0x8d   :  { %195 = vmatpush.bf16.xpose.msra.mxu3 %v186_v15  ;;  %v1278_v15 = vld [vmem:[%s1679_s7 + $0x18] sm:$0xff] }
  0x8e   :  { %v86_v17 = vpop.f32.mrf.mxu0 }
  0x8f   :  { %v130_v18 = vpop.f32.mrf.mxu1  ;;  %v87_v21 = vadd.f32 %v1294_v6, %v86_v17 }
  0x90   :  { %v131_v20 = vadd.f32 %v1295_v7, %v130_v18 }
  0x91   :  { %v90_v25 = vmul.f32 0.35355338, %v87_v21 }
  0x92   :  { %v178_v22 = vpack.c.bf16 %v131_v20, %v131_v20 }
  0x93   :  { %v176_v27 = vpack.c.bf16 %v90_v25, %v90_v25 }
  0x94   :  { %1115 = vmatmul.msk.bf16.vlgmr.msra.gmra.mxu3 %vm181_vm1, %v175_v19  ;;  %v205_v24 = vsel %vm181_vm1, %v178_v22, 0  ;;  %v1277_v19 = vld [vmem:[%s1679_s7 + $0x10] sm:$0xff] }
  0x95   :  { %319 = vmatpush.bf16.msrb.mxu3 %v1274_v13  ;;  %214 = vmatpush.bf16.xpose.msrb.mxu0 %v205_v24  ;;  %v170_v0 = vpop.f32.mrf.mxu2 }
  0x96   :  { %v171_v3 = vadd.f32 %v1298_v1, %v170_v0 }
  0x98   :  { %v179_v8 = vpack.c.bf16 %v171_v3, %v171_v3 }
  0x99   :  { %320 = vmatpush.bf16.msrb.mxu3 %v1273_v16 }
  0x9a   :  { %v255_v11 = vsel %vm253_vm2, %v179_v8, 0  ;;  %v1282_v8 = vld [vmem:[%s1677_s5 + $0x28] sm:$0xff] }
  0x9b   :  { %264 = vmatpush.bf16.msrb.mxu1 %v255_v11  ;;  %v1279_v11 = vld [vmem:[%s1675_s3 + $0x20] sm:$0xff] }
  0x9c   :  { %1116 = vmatmul.msk.bf16.vlgmr.msrb.gmra.mxu0 %vm181_vm1, %v176_v27 }
  0x9d   :  { %357 = vmatpush.bf16.msra.mxu0 %v1276_v23  ;;  %v172_v2 = vpop.f32.mrf.mxu2 }
  0x9e   :  { %v173_v6 = vadd.f32 %v1298_v1, %v172_v2 }
  0x9f   :  { %393 = vmatpush.bf16.msra.mxu1 %v1278_v15 }
  0xa0   :  { %v180_v9 = vpack.c.bf16 %v173_v6, %v173_v6 }
  0xa1   :  { %358 = vmatpush.bf16.msra.mxu0 %v1275_v26 }
  0xa2   :  { %v274_v12 = vsel %vm253_vm2, %v180_v9, 0  ;;  %v1281_v9 = vld [vmem:[%s1677_s5 + $0x20] sm:$0xff] }
  0xa3   :  { %283 = vmatpush.bf16.msrb.mxu2 %v274_v12  ;;  %394 = vmatpush.bf16.msra.mxu1 %v1277_v19  ;;  %v1165_v19 = vld [vmem:[%s1681_s9 + $0x4] sm:$0xf] }
  0xa4   :  { %1132 = vmatmul.msk.bf16.vlgmr.msrb.gmra.mxu3 %vm71_vm0, %v1443_v4 }
  0xac   :  { %1146 = vmatmul.msk.bf16.vlgmr.msra.gmra.mxu0 %vm71_vm0, %v1448_v5 }
 0x117   :  { %v197_v28 = vpop.f32.mrf.mxu3 }
 0x118   :  { %v220_v29 = vsel %vm181_vm1, %v197_v28, -inf }
 0x119   :  { %v216_v30 = vpop.f32.mrf.mxu0  ;;  %221 = vmax.xlane.f32.xlu1 %v220_v29 }
 0x11a   :  { %v223_v31 = vsel %vm181_vm1, %v216_v30, -inf }
 0x11b   :  { %224 = vmax.xlane.f32.xlu0 %v223_v31 }
 0x11f   :  { %v199_v33 = vpop.f32.mrf.mxu3 }
 0x121   :  { %v218_v35 = vpop.f32.mrf.mxu0 }
 0x127   :  { %v322_v38 = vpop.f32.mrf.mxu3 }
 0x128   :  { %v1501_v40 = vadd.f32 %v1297_v37, %v322_v38 }
 0x129   :  { %v360_v41 = vpop.f32.mrf.mxu0 }
 0x12a   :  { %v361_v42 = vadd.f32 %v1296_v39, %v360_v41  ;;  %v327_v29 = vmul.f32 0.35355338, %v1501_v40 }
 0x12c   :  { %v403_v7 = vpack.c.bf16 %v361_v42, %v361_v42 }
 0x12e   :  { %v411_v10 = vsel %vm181_vm1, %v403_v7, 0 }
 0x12f   :  { %v324_v43 = vpop.f32.mrf.mxu3  ;;  %420 = vmatpush.bf16.xpose.msra.mxu2 %v411_v10  ;;  %v1280_v10 = vld [vmem:[%s1675_s3 + $0x28] sm:$0xff] }
 0x130   :  { %v325_v46 = vadd.f32 %v1297_v37, %v324_v43  ;;  %v290_v37 = vld [vmem:[%s1681_s9] sm:$0xf] }
 0x131   :  { %v362_v44 = vpop.f32.mrf.mxu0  ;;  %v540_v38 = vsel %vm253_vm2, %v290_v37, 0  ;;  %v1299_v43 = vld [vmem:[%s1680_s8 + $0x1] ss:$0 sm:$0xff] }
 0x132   :  { %v363_v45 = vadd.f32 %v1296_v39, %v362_v44  ;;  %v328_v49 = vmul.f32 0.35355338, %v325_v46 }
 0x134   :  { %v404_v47 = vpack.c.bf16 %v363_v45, %v363_v45  ;;  %v402_v50 = vpack.c.bf16 %v328_v49, %v328_v49 }
 0x136   :  { %v430_v48 = vsel %vm181_vm1, %v404_v47, 0 }
 0x137   :  { %439 = vmatpush.bf16.xpose.msra.mxu3 %v430_v48 }
 0x13e   :  { %1162 = vmatmul.msk.bf16.vlgmr.msra.gmra.mxu3 %vm181_vm1, %v402_v50 }
 0x13f   :  { %549 = vmatpush.bf16.msrb.mxu3 %v540_v38 }
 0x18c   :  { %v222_v51 = vpop.xlane.xlu1 %221 }
 0x18d   :  { %v226_v52 = vsub.f32 %v197_v28, %v222_v51 }
 0x18e   :  { %v225_v53 = vpop.xlane.xlu0 %224 }
 0x18f   :  { %v228_v54 = vmul.f32 1.442695, %v226_v52  ;;  %v227_v55 = vsub.f32 %v216_v30, %v225_v53  ;;  %v401_v30 = vpack.c.bf16 %v327_v29, %v327_v29 }
 0x191   :  { %1307 = vpow2.f32 %v228_v54  ;;  %v230_v56 = vmul.f32 1.442695, %v227_v55 }
 0x193   :  { %1309 = vpow2.f32 %v230_v56 }
 0x197   :  { %v1308_v57 = vpop.eup %1307 }
 0x198   :  { %v232_v58 = vsel %vm181_vm1, %v1308_v57, 0.0 }
 0x199   :  { %v1310_v59 = vpop.eup %1309  ;;  %233 = vadd.xlane.f32.xlu1 %v232_v58 }
 0x19a   :  { %v235_v60 = vsel %vm181_vm1, %v1310_v59, 0.0 }
 0x19b   :  { %236 = vadd.xlane.f32.xlu0 %v235_v60 }
 0x1c1   :  { %v441_v61 = vpop.f32.mrf.mxu3 }
 0x1c2   :  { %v448_v62 = vsel %vm181_vm1, %v441_v61, -inf }
 0x1c3   :  { %449 = vmax.xlane.f32.xlu2 %v448_v62 }
 0x1c9   :  { %v443_v63 = vpop.f32.mrf.mxu3 }
 0x20c   :  { %v234_v13 = vpop.xlane.xlu1 %233 }
 0x20d   :  { %1311 = vrcp.f32 %v234_v13 }
 0x20e   :  { %v237_v14 = vpop.xlane.xlu0 %236 }
 0x20f   :  { %1313 = vrcp.f32 %v237_v14 }
 0x213   :  { %v1312_v16 = vpop.eup %1311 }
 0x214   :  { %v240_v17 = vmul.f32 %v1312_v16, %v234_v13 }
 0x215   :  { %v1314_v18 = vpop.eup %1313 }
 0x216   :  { %v242_v20 = vsub.f32 2.0, %v240_v17  ;;  %v241_v21 = vmul.f32 %v1314_v18, %v237_v14 }
 0x218   :  { %v244_v22 = vmul.f32 %v1312_v16, %v242_v20  ;;  %v243_v23 = vsub.f32 2.0, %v241_v21  ;;  %v520_v20 = vsel %vm253_vm2, %v1165_v19, 0  ;;  %v1300_v21 = vld [vmem:[%s1678_s6 + $0x2] ss:$0 sm:$0xff] }
 0x21a   :  { %v246_v24 = vmul.f32 %v1308_v57, %v244_v22  ;;  %v245_v25 = vmul.f32 %v1314_v18, %v243_v23 }
 0x21c   :  { %v248_v26 = vpack.c.bf16 %v246_v24, %v246_v24  ;;  %v247_v27 = vmul.f32 %v1310_v59, %v245_v25 }
 0x21e   :  { %v249_v28 = vpack.c.bf16 %v247_v27, %v247_v27  ;;  %1117 = vmatmul.msk.bf16.vlgmr.msrb.gmra.mxu1 %vm181_vm1, %v248_v26 }
 0x220   :  { %1118 = vmatmul.msk.bf16.vlgmr.msrb.gmra.mxu2 %vm181_vm1, %v249_v28 }
 0x221   :  { %529 = vmatpush.bf16.msrb.mxu2 %v520_v20 }
 0x22e   :  { %1160 = vmatmul.msk.bf16.vlgmr.msra.gmra.mxu1 %vm71_vm0, %v1491_v36 }
 0x230   :  { %1161 = vmatmul.msk.bf16.vlgmr.msra.gmra.mxu2 %vm181_vm1, %v401_v30 }
 0x236   :  { %v450_v31 = vpop.xlane.xlu2 %449 }
 0x237   :  { %v452_v32 = vsub.f32 %v441_v61, %v450_v31 }
 0x239   :  { %v455_v33 = vmul.f32 1.442695, %v452_v32 }
 0x23b   :  { %1315 = vpow2.f32 %v455_v33  ;;  %v1301_v33 = vld [vmem:[%s1676_s4 + $0x2] ss:$0 sm:$0xff] }
 0x241   :  { %v1316_v34 = vpop.eup %1315 }
 0x242   :  { %v460_v35 = vsel %vm181_vm1, %v1316_v34, 0.0 }
 0x243   :  { %461 = vadd.xlane.f32.xlu0 %v460_v35 }
 0x29b   :  { %v266_v39 = vpop.f32.mrf.mxu1 }
 0x2a3   :  { %v268_v40 = vpop.f32.mrf.mxu1  ;;  %v285_v41 = vpop.f32.mrf.mxu2 }
 0x2a4   :  { %v289_v42 = vpack.c.bf16 %v285_v41, %v266_v39 }
 0x2a6   :  { %1167 = vmatmul.msk.bf16.vlgmr.msrb.gmra.mxu3 %vm181_vm1, %v289_v42 }
 0x2ab   :  { %v287_v44 = vpop.f32.mrf.mxu2  ;;  %v396_v45 = vpop.f32.mrf.mxu1 }
 0x2ac   :  { %v397_v46 = vadd.f32 %v1299_v43, %v396_v45  ;;  %v1283_v44 = vld [vmem:[%s1679_s7 + $0x20] sm:$0xff] }
 0x2ae   :  { %v405_v47 = vpack.c.bf16 %v397_v46, %v397_v46 }
 0x2b0   :  { %v479_v48 = vsel %vm253_vm2, %v405_v47, 0 }
 0x2b1   :  { %488 = vmatpush.bf16.msrb.mxu0 %v479_v48 }
 0x2b3   :  { %v422_v49 = vpop.f32.mrf.mxu2  ;;  %v398_v50 = vpop.f32.mrf.mxu1 }
 0x2b4   :  { %v445_v51 = vsel %vm181_vm1, %v422_v49, -inf  ;;  %v399_v52 = vadd.f32 %v1299_v43, %v398_v50  ;;  %v1284_v43 = vld [vmem:[%s1679_s7 + $0x28] sm:$0xff] }
 0x2b5   :  { %446 = vmax.xlane.f32.xlu2 %v445_v51  ;;  %584 = vmatpush.bf16.msra.mxu0 %v1280_v10 }
 0x2b6   :  { %v462_v53 = vpop.xlane.xlu0 %461  ;;  %v406_v54 = vpack.c.bf16 %v399_v52, %v399_v52  ;;  %658 = vmatpush.bf16.msra.mxu2 %v1284_v43 }
 0x2b7   :  { %1317 = vrcp.f32 %v462_v53 }
 0x2b8   :  { %v498_v55 = vsel %vm253_vm2, %v406_v54, 0 }
 0x2b9   :  { %507 = vmatpush.bf16.msrb.mxu1 %v498_v55  ;;  %585 = vmatpush.bf16.msra.mxu0 %v1279_v11  ;;  %v1302_v55 = vld [vmem:[%s1680_s8 + $0x2] ss:$0 sm:$0xff] }
 0x2ba   :  { %659 = vmatpush.bf16.msra.mxu2 %v1283_v44 }
 0x2bb   :  { %v424_v56 = vpop.f32.mrf.mxu2 }
 0x2bd   :  { %v1318_v57 = vpop.eup %1317  ;;  %622 = vmatpush.bf16.msra.mxu1 %v1282_v8 }
 0x2be   :  { %v466_v58 = vmul.f32 %v1318_v57, %v462_v53 }
 0x2c0   :  { %v468_v59 = vsub.f32 2.0, %v466_v58 }
 0x2c1   :  { %623 = vmatpush.bf16.msra.mxu1 %v1281_v9 }
 0x2c2   :  { %v470_v60 = vmul.f32 %v1318_v57, %v468_v59 }
 0x2c4   :  { %v472_v61 = vmul.f32 %v1316_v34, %v470_v60 }
 0x2c6   :  { %v474_v62 = vpack.c.bf16 %v472_v61, %v472_v61 }
 0x2c8   :  { %1164 = vmatmul.msk.bf16.vlgmr.msrb.gmra.mxu1 %vm181_vm1, %v474_v62 }
 0x2d8   :  { %1195 = vmatmul.msk.bf16.vlgmr.msra.gmra.mxu1 %vm71_vm0, %v1448_v5 }
 0x328   :  { %v447_v63 = vpop.xlane.xlu2 %446 }
 0x329   :  { %v451_v0 = vsub.f32 %v422_v49, %v447_v63  ;;  %v1578_v45 = vpop.f32.mrf.mxu3 }
 0x32b   :  { %v453_v1 = vmul.f32 1.442695, %v451_v0 }
 0x32d   :  { %1319 = vpow2.f32 %v453_v1 }
 0x331   :  { %v1582_v46 = vpop.f32.mrf.mxu3 }
 0x333   :  { %v1320_v2 = vpop.eup %1319 }
 0x334   :  { %v457_v3 = vsel %vm181_vm1, %v1320_v2, 0.0 }
 0x335   :  { %458 = vadd.xlane.f32.xlu1 %v457_v3 }
 0x345   :  { %v509_v6 = vpop.f32.mrf.mxu1 }
 0x34d   :  { %v511_v7 = vpop.f32.mrf.mxu1 }
 0x355   :  { %v625_v22 = vpop.f32.mrf.mxu1 }
 0x356   :  { %v626_v23 = vadd.f32 %v1300_v21, %v625_v22 }
 0x358   :  { %v668_v24 = vpack.c.bf16 %v626_v23, %v626_v23 }
 0x35a   :  { %v676_v25 = vsel %vm181_vm1, %v668_v24, 0 }
 0x35b   :  { %685 = vmatpush.bf16.xpose.msra.mxu3 %v676_v25 }
 0x35d   :  { %v627_v26 = vpop.f32.mrf.mxu1 }
 0x35e   :  { %v628_v27 = vadd.f32 %v1300_v21, %v627_v26 }
 0x360   :  { %v669_v28 = vpack.c.bf16 %v628_v27, %v628_v27 }
 0x362   :  { %v695_v29 = vsel %vm181_vm1, %v669_v28, 0 }
 0x3a8   :  { %v459_v12 = vpop.xlane.xlu1 %458 }
 0x3a9   :  { %1321 = vrcp.f32 %v459_v12 }
 0x3af   :  { %v1322_v13 = vpop.eup %1321 }
 0x3b0   :  { %v465_v14 = vmul.f32 %v1322_v13, %v459_v12  ;;  %v1288_v12 = vld [vmem:[%s1677_s5 + $0x38] sm:$0xff] }
 0x3b2   :  { %v467_v15 = vsub.f32 2.0, %v465_v14  ;;  %v1287_v14 = vld [vmem:[%s1677_s5 + $0x30] sm:$0xff] }
 0x3b4   :  { %v469_v16 = vmul.f32 %v1322_v13, %v467_v15  ;;  %v1286_v13 = vld [vmem:[%s1675_s3 + $0x38] sm:$0xff]  ;;  %v1285_v15 = vld [vmem:[%s1675_s3 + $0x30] sm:$0xff] }
 0x3b6   :  { %v471_v17 = vmul.f32 %v1320_v2, %v469_v16 }
 0x3b8   :  { %v473_v18 = vpack.c.bf16 %v471_v17, %v471_v17 }
 0x3ba   :  { %1163 = vmatmul.msk.bf16.vlgmr.msrb.gmra.mxu0 %vm181_vm1, %v473_v18 }
 0x3bb   :  { %704 = vmatpush.bf16.xpose.msrb.mxu0 %v695_v29 }
 0x3ca   :  { %1181 = vmatmul.msk.bf16.vlgmr.msra.gmra.mxu0 %vm71_vm0, %v1443_v4 }
 0x3cb   :  { %831 = vmatpush.bf16.msra.mxu0 %v1286_v13 }
 0x3cf   :  { %832 = vmatpush.bf16.msra.mxu0 %v1285_v15 }
 0x437   :  { %v490_v30 = vpop.f32.mrf.mxu0 }
 0x438   :  { %v513_v31 = vpack.c.bf16 %v509_v6, %v490_v30 }
 0x43a   :  { %1166 = vmatmul.msk.bf16.vlgmr.msrb.gmra.mxu2 %vm181_vm1, %v513_v31 }
 0x43f   :  { %v492_v32 = vpop.f32.mrf.mxu0 }
 0x447   :  { %v587_v34 = vpop.f32.mrf.mxu0 }
 0x448   :  { %v588_v35 = vadd.f32 %v1301_v33, %v587_v34 }
 0x44a   :  { %v592_v37 = vmul.f32 0.35355338, %v588_v35  ;;  %1209 = vmatmul.msk.bf16.vlgmr.msra.gmra.mxu2 %vm71_vm0, %v1491_v36  ;;  %v1303_v35 = vld [vmem:[%s1678_s6 + $0x3] ss:$0 sm:$0xff] }
 0x44c   :  { %v666_v38 = vpack.c.bf16 %v592_v37, %v592_v37 }
 0x44e   :  { %1210 = vmatmul.msk.bf16.vlgmr.msra.gmra.mxu3 %vm181_vm1, %v666_v38 }
 0x44f   :  { %v589_v39 = vpop.f32.mrf.mxu0 }
 0x450   :  { %v590_v40 = vadd.f32 %v1301_v33, %v589_v39 }
 0x452   :  { %v593_v41 = vmul.f32 0.35355338, %v590_v40 }
 0x454   :  { %v667_v42 = vpack.c.bf16 %v593_v41, %v593_v41 }
 0x456   :  { %1211 = vmatmul.msk.bf16.vlgmr.msrb.gmra.mxu0 %vm181_vm1, %v667_v42 }
 0x466   :  { %1229 = vmatmul.msk.bf16.vlgmr.msra.gmra.mxu0 %vm71_vm0, %v1443_v4  ;;  %v1214_v4 = vld [vmem:[%s1681_s9 + $0x8] sm:$0xf] }
 0x467   :  { %v785_v30 = vsel %vm253_vm2, %v1214_v4, 0 }
 0x468   :  { %794 = vmatpush.bf16.msrb.mxu3 %v785_v30 }
 0x4bd   :  { %v1586_v53 = vpop.f32.mrf.mxu2 }
 0x4c5   :  { %v1588_v54 = vpop.f32.mrf.mxu2 }
 0x4cd   :  { %v661_v58 = vpop.f32.mrf.mxu2 }
 0x4ce   :  { %v662_v60 = vadd.f32 %v1302_v55, %v661_v58  ;;  %v1290_v58 = vld [vmem:[%s1679_s7 + $0x38] sm:$0xff] }
 0x4d0   :  { %v670_v63 = vpack.c.bf16 %v662_v60, %v662_v60  ;;  %v552_v60 = vadd.f32 %v1578_v45, %v1586_v53 }
 0x4d1   :  { %v687_v47 = vpop.f32.mrf.mxu3 }
 0x4d2   :  { %v710_v48 = vsel %vm181_vm1, %v687_v47, -inf  ;;  %v744_v1 = vsel %vm253_vm2, %v670_v63, 0  ;;  %v554_v63 = vadd.f32 %v1582_v46, %v1588_v54 }
 0x4d3   :  { %v706_v49 = vpop.f32.mrf.mxu0  ;;  %711 = vmax.xlane.f32.xlu2 %v710_v48  ;;  %753 = vmatpush.bf16.msrb.mxu1 %v744_v1 }
 0x4d4   :  { %v713_v50 = vsel %vm181_vm1, %v706_v49, -inf }
 0x4d5   :  { %714 = vmax.xlane.f32.xlu0 %v713_v50  ;;  %v663_v8 = vpop.f32.mrf.mxu2 }
 0x4d6   :  { %v664_v9 = vadd.f32 %v1302_v55, %v663_v8 }
 0x4d7   :  { %869 = vmatpush.bf16.msra.mxu1 %v1288_v12 }
 0x4d8   :  { %v671_v10 = vpack.c.bf16 %v664_v9, %v664_v9 }
 0x4d9   :  { %v689_v51 = vpop.f32.mrf.mxu3 }
 0x4da   :  { %v763_v11 = vsel %vm253_vm2, %v671_v10, 0 }
 0x4db   :  { %v708_v52 = vpop.f32.mrf.mxu0  ;;  %772 = vmatpush.bf16.msrb.mxu2 %v763_v11  ;;  %870 = vmatpush.bf16.msra.mxu1 %v1287_v14 }
 0x4df   :  { %905 = vmatpush.bf16.msra.mxu2 %v1290_v58 }
 0x4e3   :  { %v834_v37 = vpop.f32.mrf.mxu0 }
 0x4eb   :  { %v836_v48 = vpop.f32.mrf.mxu0 }
 0x546   :  { %v712_v56 = vpop.xlane.xlu2 %711 }
 0x547   :  { %v716_v57 = vsub.f32 %v687_v47, %v712_v56 }
 0x548   :  { %v715_v59 = vpop.xlane.xlu0 %714 }
 0x549   :  { %v718_v61 = vmul.f32 1.442695, %v716_v57  ;;  %v717_v62 = vsub.f32 %v706_v49, %v715_v59  ;;  %v1289_v59 = vld [vmem:[%s1679_s7 + $0x30] sm:$0xff] }
 0x54a   :  { %906 = vmatpush.bf16.msra.mxu2 %v1289_v59 }
 0x54b   :  { %1323 = vpow2.f32 %v718_v61  ;;  %v720_v0 = vmul.f32 1.442695, %v717_v62 }
 0x54d   :  { %1325 = vpow2.f32 %v720_v0 }
 0x551   :  { %v1324_v2 = vpop.eup %1323 }
 0x552   :  { %v722_v3 = vsel %vm181_vm1, %v1324_v2, 0.0 }
 0x553   :  { %v1326_v6 = vpop.eup %1325  ;;  %723 = vadd.xlane.f32.xlu1 %v722_v3 }
 0x554   :  { %v725_v7 = vsel %vm181_vm1, %v1326_v6, 0.0 }
 0x555   :  { %726 = vadd.xlane.f32.xlu2 %v725_v7 }
 0x5c6   :  { %v724_v16 = vpop.xlane.xlu1 %723 }
 0x5c7   :  { %1327 = vrcp.f32 %v724_v16 }
 0x5c8   :  { %v727_v17 = vpop.xlane.xlu2 %726 }
 0x5c9   :  { %1329 = vrcp.f32 %v727_v17 }
 0x5cd   :  { %v1328_v18 = vpop.eup %1327 }
 0x5ce   :  { %v730_v19 = vmul.f32 %v1328_v18, %v724_v16 }
 0x5cf   :  { %v1330_v20 = vpop.eup %1329 }
 0x5d0   :  { %v732_v21 = vsub.f32 2.0, %v730_v19  ;;  %v731_v22 = vmul.f32 %v1330_v20, %v727_v17 }
 0x5d2   :  { %v734_v23 = vmul.f32 %v1328_v18, %v732_v21  ;;  %v733_v24 = vsub.f32 2.0, %v731_v22 }
 0x5d4   :  { %v736_v25 = vmul.f32 %v1324_v2, %v734_v23  ;;  %v735_v26 = vmul.f32 %v1330_v20, %v733_v24 }
 0x5d6   :  { %v738_v27 = vpack.c.bf16 %v736_v25, %v736_v25  ;;  %v737_v28 = vmul.f32 %v1326_v6, %v735_v26 }
 0x5d8   :  { %v739_v29 = vpack.c.bf16 %v737_v28, %v737_v28  ;;  %1212 = vmatmul.msk.bf16.vlgmr.msrb.gmra.mxu1 %vm181_vm1, %v738_v27 }
 0x5da   :  { %1213 = vmatmul.msk.bf16.vlgmr.msrb.gmra.mxu2 %vm181_vm1, %v739_v29 }
 0x5e8   :  { %1243 = vmatmul.msk.bf16.vlgmr.msra.gmra.mxu1 %vm71_vm0, %v1448_v5  ;;  %v1304_v5 = vld [vmem:[%s1676_s4 + $0x3] ss:$0 sm:$0xff] }
 0x5e9   :  { %v835_v41 = vadd.f32 %v1304_v5, %v834_v37  ;;  %v837_v52 = vadd.f32 %v1304_v5, %v836_v48  ;;  %v1262_v37 = vld [vmem:[%s1681_s9 + $0xc] sm:$0xf]  ;;  %s1365_s9 = smov [#allocation2]  }
 0x5ea   :  { %1257 = vmatmul.msk.bf16.vlgmr.msra.gmra.mxu2 %vm71_vm0, %v1491_v36  ;;  %v1305_v36 = vld [vmem:[%s1680_s8 + $0x3] ss:$0 sm:$0xff]  ;;  %s1062_s1 = sshll.u32 %s1365_s9, 4  ;;  %s1063_s1 = int_to_ptr.vmem [resolvable:$true] %s1062_s1 }
 0x5eb   :  { %v839_v44 = vmul.f32 0.35355338, %v835_v41  ;;  %v840_v56 = vmul.f32 0.35355338, %v837_v52 }
 0x5ed   :  { %v913_v49 = vpack.c.bf16 %v839_v44, %v839_v44  ;;  %v914_v57 = vpack.c.bf16 %v840_v56, %v840_v56  ;;  %v1306_v44 = vld [vmem:[%s1682_s10] ss:$0 sm:$0xff]  ;;  %s1366_s10 = smov 128  }
 0x655   :  { %v755_v31 = vpop.f32.mrf.mxu1 }
 0x65d   :  { %v757_v32 = vpop.f32.mrf.mxu1  ;;  %v774_v33 = vpop.f32.mrf.mxu2 }
 0x65e   :  { %v778_v34 = vpack.c.bf16 %v774_v33, %v755_v31 }
 0x660   :  { %1215 = vmatmul.msk.bf16.vlgmr.msrb.gmra.mxu3 %vm181_vm1, %v778_v34 }
 0x665   :  { %v776_v38 = vpop.f32.mrf.mxu2  ;;  %v872_v39 = vpop.f32.mrf.mxu1 }
 0x666   :  { %v873_v40 = vadd.f32 %v1303_v35, %v872_v39  ;;  %v1032_v38 = vsel %vm253_vm2, %v1262_v37, 0 }
 0x668   :  { %v915_v42 = vpack.c.bf16 %v873_v40, %v873_v40 }
 0x66a   :  { %v923_v43 = vsel %vm181_vm1, %v915_v42, 0 }
 0x66b   :  { %932 = vmatpush.bf16.xpose.msra.mxu3 %v923_v43 }
 0x66d   :  { %v874_v47 = vpop.f32.mrf.mxu1  ;;  %v908_v46 = vpop.f32.mrf.mxu2 }
 0x66e   :  { %v875_v50 = vadd.f32 %v1303_v35, %v874_v47  ;;  %v909_v10 = vadd.f32 %v1305_v36, %v908_v46 }
 0x670   :  { %v916_v51 = vpack.c.bf16 %v875_v50, %v875_v50  ;;  %v917_v13 = vpack.c.bf16 %v909_v10, %v909_v10 }
 0x672   :  { %v942_v55 = vsel %vm181_vm1, %v916_v51, 0  ;;  %1258 = vmatmul.msk.bf16.vlgmr.msra.gmra.mxu3 %vm181_vm1, %v913_v49  ;;  %v991_v15 = vsel %vm253_vm2, %v917_v13, 0 }
 0x673   :  { %951 = vmatpush.bf16.xpose.msrb.mxu0 %v942_v55  ;;  %1000 = vmatpush.bf16.msrb.mxu1 %v991_v15 }
 0x674   :  { %1041 = vmatpush.bf16.msrb.mxu3 %v1032_v38 }
 0x675   :  { %v910_v16 = vpop.f32.mrf.mxu2 }
 0x676   :  { %v911_v17 = vadd.f32 %v1305_v36, %v910_v16 }
 0x678   :  { %v918_v20 = vpack.c.bf16 %v911_v17, %v911_v17 }
 0x67a   :  { %1259 = vmatmul.msk.bf16.vlgmr.msrb.gmra.mxu0 %vm181_vm1, %v914_v57  ;;  %v1010_v23 = vsel %vm253_vm2, %v918_v20, 0 }
 0x67b   :  { %1019 = vmatpush.bf16.msrb.mxu2 %v1010_v23 }
 0x6e3   :  { %v796_v61 = vpop.f32.mrf.mxu3 }
 0x6e4   :  { %v1638_v62 = vadd.f32 %v796_v61, %v552_v60 }
 0x6eb   :  { %v798_v0 = vpop.f32.mrf.mxu3 }
 0x6ec   :  { %v1644_v1 = vadd.f32 %v798_v0, %v554_v63 }
 0x6f5   :  { %v934_v2 = vpop.f32.mrf.mxu3 }
 0x6f6   :  { %v957_v3 = vsel %vm181_vm1, %v934_v2, -inf }
 0x6f7   :  { %v953_v6 = vpop.f32.mrf.mxu0  ;;  %958 = vmax.xlane.f32.xlu1 %v957_v3 }
 0x6f8   :  { %v960_v45 = vsel %vm181_vm1, %v953_v6, -inf }
 0x6f9   :  { %961 = vmax.xlane.f32.xlu0 %v960_v45 }
 0x6fd   :  { %v936_v53 = vpop.f32.mrf.mxu3 }
 0x6ff   :  { %v955_v7 = vpop.f32.mrf.mxu0 }
 0x76a   :  { %v959_v8 = vpop.xlane.xlu1 %958 }
 0x76b   :  { %v963_v9 = vsub.f32 %v934_v2, %v959_v8 }
 0x76c   :  { %v962_v54 = vpop.xlane.xlu0 %961 }
 0x76d   :  { %v965_v11 = vmul.f32 1.442695, %v963_v9  ;;  %v964_v12 = vsub.f32 %v953_v6, %v962_v54 }
 0x76f   :  { %1331 = vpow2.f32 %v965_v11  ;;  %v967_v14 = vmul.f32 1.442695, %v964_v12 }
 0x771   :  { %1333 = vpow2.f32 %v967_v14 }
 0x775   :  { %v1332_v18 = vpop.eup %1331 }
 0x776   :  { %v969_v19 = vsel %vm181_vm1, %v1332_v18, 0.0 }
 0x777   :  { %v1334_v21 = vpop.eup %1333  ;;  %970 = vadd.xlane.f32.xlu0 %v969_v19 }
 0x778   :  { %v972_v22 = vsel %vm181_vm1, %v1334_v21, 0.0 }
 0x779   :  { %973 = vadd.xlane.f32.xlu2 %v972_v22 }
 0x7ea   :  { %v971_v24 = vpop.xlane.xlu0 %970 }
 0x7eb   :  { %1335 = vrcp.f32 %v971_v24 }
 0x7ec   :  { %v974_v25 = vpop.xlane.xlu2 %973 }
 0x7ed   :  { %1337 = vrcp.f32 %v974_v25 }
 0x7f1   :  { %v1336_v26 = vpop.eup %1335 }
 0x7f2   :  { %v977_v27 = vmul.f32 %v1336_v26, %v971_v24 }
 0x7f3   :  { %v1338_v28 = vpop.eup %1337 }
 0x7f4   :  { %v979_v29 = vsub.f32 2.0, %v977_v27  ;;  %v978_v4 = vmul.f32 %v1338_v28, %v974_v25 }
 0x7f6   :  { %v981_v30 = vmul.f32 %v1336_v26, %v979_v29  ;;  %v980_v31 = vsub.f32 2.0, %v978_v4 }
 0x7f8   :  { %v983_v32 = vmul.f32 %v1332_v18, %v981_v30  ;;  %v982_v33 = vmul.f32 %v1338_v28, %v980_v31 }
 0x7fa   :  { %v985_v34 = vpack.c.bf16 %v983_v32, %v983_v32  ;;  %v984_v35 = vmul.f32 %v1334_v21, %v982_v33 }
 0x7fc   :  { %v986_v5 = vpack.c.bf16 %v984_v35, %v984_v35  ;;  %1260 = vmatmul.msk.bf16.vlgmr.msrb.gmra.mxu1 %vm181_vm1, %v985_v34 }
 0x7fe   :  { %1261 = vmatmul.msk.bf16.vlgmr.msrb.gmra.mxu2 %vm181_vm1, %v986_v5 }
 0x879   :  { %v1002_v39 = vpop.f32.mrf.mxu1 }
 0x881   :  { %v1004_v40 = vpop.f32.mrf.mxu1  ;;  %v1021_v41 = vpop.f32.mrf.mxu2 }
 0x882   :  { %v1025_v42 = vpack.c.bf16 %v1021_v41, %v1002_v39 }
 0x884   :  { %1263 = vmatmul.msk.bf16.vlgmr.msrb.gmra.mxu3 %vm181_vm1, %v1025_v42 }
 0x889   :  { %v1023_v43 = vpop.f32.mrf.mxu2 }
 0x907   :  { %v1043_v47 = vpop.f32.mrf.mxu3 }
 0x908   :  { %v1048_v48 = vadd.f32 %v1043_v47, %v1638_v62 }
 0x90a   :  { %v1054_v49 = vadd.f32 %v1306_v44, %v1048_v48 }
 0x90c   :  { %1056 = vst.msk [vmem:[#allocation2] sm:$0xff] %vm71_vm0, %v1054_v49 }
 0x90f   :  { %v1045_v50 = vpop.f32.mrf.mxu3 }
 0x910   :  { %v1049_v51 = vadd.f32 %v1045_v50, %v1644_v1 }
 0x912   :  { %v1055_v52 = vadd.f32 %v1306_v44, %v1049_v51 }
 0x914   :  { %1057 = vst.msk [vmem:[#allocation2 + $0x8] sm:$0xff] %vm71_vm0, %v1055_v52 }
 0x915   :  { %1070 = dma.vmem_to_hbm [thread:$0]  %s1063_s1, 256, %s1065_s15, [#allocation3], %s1366_s10, %s1366_s10, %s1367_s16  }
 0x916   :  { %1363 = dma.done.wait [#allocation3], 256  }
 0x917   :  { %1364 = vsyncadd [#allocation3], 4294967040 }
 0x918   :  { %1075 = vsyncpa [#allocation3], 1 }

</bundles_post_ra>
